<compile_context>
chip_gen: v7x
topology: tpu7x:2x2x1
jax: 0.10.0
libtpu: 0.0.40
codegen_flags: <defaults>
</compile_context>

<pallas_src>
import functools

import jax
import jax.numpy as jnp
from jax.experimental import pallas as pl
from jax.experimental.pallas import tpu as pltpu


def _round_up(x, m):
    return (x + m - 1) // m * m


# ----------------------------------------------------------------------------
# Kernel
# ----------------------------------------------------------------------------
def _fusion_kernel(scal_ref, gf_ref, lf_ref, w_ref, b_ref, out_ref, *, G, L, NP):
    """scal_ref: [3] SMEM (bgc, blc, brc); gf_ref: [tb, G]; lf_ref: [tb, L];
    w_ref: [4*NP, NP] (bf16 or f32) resident in VMEM; b_ref: [16, NP] f32;
    out_ref: [tb, G+L]."""
    f32 = jnp.float32
    GL = G + L
    wdt = w_ref.dtype

    gf = gf_ref[...]                                    # [tb, G] f32
    lf = lf_ref[...]                                    # [tb, L] f32

    # ---- layer 1: blockdiag(wg1, wl1) as two thin dots, f32 accumulation ----
    h1 = jnp.dot(gf.astype(wdt), w_ref[0:G, :], preferred_element_type=f32)
    h1 = h1 + jnp.dot(lf.astype(wdt), w_ref[G:GL, :], preferred_element_type=f32)
    h1 = jnp.maximum(h1 + b_ref[0:1, :], 0.0)           # [tb, NP]; cols >= GL are 0

    # ---- layer 2: refined = relu(h1) @ blockdiag(wg2, wl2) + (bg2|bl2) ----
    refined = (jnp.dot(h1.astype(wdt), w_ref[NP:2 * NP, :], preferred_element_type=f32)
               + b_ref[1:2, :])                          # [tb, NP]; cols >= GL are 0

    # ---- confidences: rank-1 reductions (f32, VPU+XLU) + EUP sigmoids ----
    # NOTE: the discarded `.network` branch of relative_confidence_network in
    # the PyTorch module has no effect on the output and is not computed.
    gc = jax.nn.sigmoid(
        jnp.sum(gf * b_ref[8:9, 0:G], axis=-1, keepdims=True) + scal_ref[0])
    lc = jax.nn.sigmoid(
        jnp.sum(lf * b_ref[9:10, 0:L], axis=-1, keepdims=True) + scal_ref[1])
    rc = jax.nn.sigmoid(
        jnp.sum(refined * b_ref[7:8, :], axis=-1, keepdims=True) + scal_ref[2])

    # ---- fusion layer 1: refined part on the MXU + rank-1 confidence rows ----
    p3 = (jnp.dot(refined.astype(wdt), w_ref[2 * NP:3 * NP, :], preferred_element_type=f32)
          + b_ref[2:3, :])
    conf_rows = b_ref[4:7, :]                            # one load for the 3 wf1 rows
    hf = jnp.maximum(p3 + gc * conf_rows[0:1, :] + lc * conf_rows[1:2, :]
                     + rc * conf_rows[2:3, :], 0.0)

    # ---- fusion layer 2; write only the first GL lanes ----
    out = (jnp.dot(hf.astype(wdt), w_ref[3 * NP:4 * NP, :], preferred_element_type=f32)
           + b_ref[3:4, :])
    out_ref[...] = out[:, :GL].astype(out_ref.dtype)


# ----------------------------------------------------------------------------
# Parameter construction / packing
# ----------------------------------------------------------------------------
def init_params(key, G, L, dtype=jnp.float32):
    """Deterministic PyTorch-Linear-style init (uniform +/- 1/sqrt(fan_in))."""
    GL = G + L
    ks = jax.random.split(key, 9)

    def lin(k, din, dout):
        kw, kb = jax.random.split(k)
        bound = 1.0 / (din ** 0.5)
        w = jax.random.uniform(kw, (din, dout), dtype, -bound, bound)
        b = jax.random.uniform(kb, (1, dout), dtype, -bound, bound)
        return w, b

    wg1, bg1 = lin(ks[0], G, G)
    wg2, bg2 = lin(ks[1], G, G)
    wgc, bgc = lin(ks[2], G, 1)
    wl1, bl1 = lin(ks[3], L, L)
    wl2, bl2 = lin(ks[4], L, L)
    wlc, blc = lin(ks[5], L, 1)
    wrc, brc = lin(ks[6], GL, 1)
    wf1, bf1 = lin(ks[7], GL + 3, GL)
    wf2, bf2 = lin(ks[8], GL, GL)

    return dict(wg1=wg1, bg1=bg1, wg2=wg2, bg2=bg2, wgc=wgc, bgc=bgc,
                wl1=wl1, bl1=bl1, wl2=wl2, bl2=bl2, wlc=wlc, blc=blc,
                wrc=wrc, brc=brc, wf1=wf1, bf1=bf1, wf2=wf2, bf2=bf2)


def pack_params(p, G, L, weight_dtype=jnp.bfloat16):
    """Pack the 4 matmul blocks into one [4*NP, NP] slab (weight_dtype), the
    biases / rank-1 rows into one [16, NP] f32 slab, and the 3 confidence
    biases into a [3] f32 SMEM vector.  NP = round_up(G+L, 128)."""
    GL = G + L
    NP = _round_up(GL, 128)
    f32 = jnp.float32

    W = jnp.zeros((4 * NP, NP), f32)
    W = W.at[0:G, 0:G].set(p["wg1"])                       # layer 1 (global)
    W = W.at[G:GL, G:GL].set(p["wl1"])                     # layer 1 (local)
    W = W.at[NP:NP + G, 0:G].set(p["wg2"])                 # layer 2 (global)
    W = W.at[NP + G:NP + GL, G:GL].set(p["wl2"])           # layer 2 (local)
    W = W.at[2 * NP:2 * NP + GL, 0:GL].set(p["wf1"][:GL])  # fusion layer 1 (refined part)
    W = W.at[3 * NP:3 * NP + GL, 0:GL].set(p["wf2"])       # fusion layer 2
    W = W.astype(weight_dtype)

    Bm = jnp.zeros((16, NP), f32)
    Bm = Bm.at[0, 0:G].set(p["bg1"][0])
    Bm = Bm.at[0, G:GL].set(p["bl1"][0])
    Bm = Bm.at[1, 0:G].set(p["bg2"][0])
    Bm = Bm.at[1, G:GL].set(p["bl2"][0])
    Bm = Bm.at[2, 0:GL].set(p["bf1"][0])
    Bm = Bm.at[3, 0:GL].set(p["bf2"][0])
    Bm = Bm.at[4, 0:GL].set(p["wf1"][GL])        # wf1 row for global confidence
    Bm = Bm.at[5, 0:GL].set(p["wf1"][GL + 1])    # wf1 row for local  confidence
    Bm = Bm.at[6, 0:GL].set(p["wf1"][GL + 2])    # wf1 row for relative confidence
    Bm = Bm.at[7, 0:GL].set(p["wrc"][:, 0])      # rank-1 row for rc logit
    Bm = Bm.at[8, 0:G].set(p["wgc"][:, 0])       # rank-1 row for gc logit
    Bm = Bm.at[9, 0:L].set(p["wlc"][:, 0])       # rank-1 row for lc logit

    scal = jnp.array([p["bgc"][0, 0], p["blc"][0, 0], p["brc"][0, 0]], f32)
    return W, Bm, scal, NP


def validate_packed(packed, G, L):
    """Explicit check of the zero-padding layout the kernel's correctness
    relies on (cheap; run once after packing)."""
    W, Bm, scal, NP = packed
    GL = G + L
    Wf = W.astype(jnp.float32)
    ok = True
    # layer-1/2 padding columns must be zero so h1/refined padding lanes stay 0
    ok &= bool(jnp.all(Wf[0:GL, GL:NP] == 0))
    ok &= bool(jnp.all(Wf[NP:NP + GL, GL:NP] == 0))
    # block-diagonal structure: cross-branch blocks are zero
    ok &= bool(jnp.all(Wf[0:G, G:GL] == 0)) and bool(jnp.all(Wf[G:GL, 0:G] == 0))
    ok &= bool(jnp.all(Wf[NP:NP + G, G:GL] == 0))
    ok &= bool(jnp.all(Wf[NP + G:NP + GL, 0:G] == 0))
    # bias / rank-1 rows: padding lanes zero
    ok &= bool(jnp.all(Bm[:, GL:NP] == 0))
    ok &= bool(jnp.all(Bm[8, G:NP] == 0)) and bool(jnp.all(Bm[9, L:NP] == 0))
    assert ok, "packed parameter slabs violate the zero-padding layout contract"
    assert scal.shape == (3,)


# ----------------------------------------------------------------------------
# Wrapper
# ----------------------------------------------------------------------------
def feature_fusion(global_features, local_features, packed, *, tb=None,
                   vmem_budget_bytes=48 << 20):
    W, Bm, scal, NP = packed
    B, G = global_features.shape
    B2, L = local_features.shape
    assert B == B2, "batch mismatch between global and local features"
    GL = G + L
    assert W.shape == (4 * NP, NP) and Bm.shape == (16, NP)

    w_bytes = int(W.size) * W.dtype.itemsize
    b_bytes = int(Bm.size) * Bm.dtype.itemsize

    # ---- batch-tile selection -------------------------------------------
    # Per-row VMEM: double-buffered gf/lf input tiles + double-buffered output
    # tile + ~6 live [*, NP] f32 intermediates in the kernel body.  The weight
    # slab is a single resident copy.  On v5e/v6e (128 MiB VMEM) the budget can
    # be raised; 48 MiB keeps headroom on v7x's 64 MiB.
    per_row = (2 * 4 * GL) + (2 * 4 * GL) + 6 * 4 * NP
    row_cap = (vmem_budget_bytes - w_bytes - b_bytes) // per_row
    row_cap = int(max(8, min(2048, row_cap)))

    if tb is None:
        if B <= row_cap:
            tb = B            # one grid step: never split tiny work across cores
        else:
            tb = 0
            d = (row_cap // 8) * 8
            while d >= 8:     # largest multiple-of-8 divisor of B that fits VMEM
                if B % d == 0:
                    tb = d
                    break
                d -= 8
            if tb == 0:       # no suitable divisor: pad the batch (rare fallback)
                tb = (row_cap // 8) * 8
    assert tb >= 1 and (tb == B or tb % 8 == 0), \
        "batch tile must be a multiple of 8 (sublane tiling) or the whole batch"

    Bp = _round_up(B, tb)
    gf, lf = global_features, local_features
    if Bp != B:
        # TODO(synk): padded-batch fallback costs one extra HBM pass over inputs.
        gf = jnp.pad(gf, ((0, Bp - B), (0, 0)))
        lf = jnp.pad(lf, ((0, Bp - B), (0, 0)))

    grid = (Bp // tb,)

    need = w_bytes + b_bytes + tb * per_row
    vmem_limit = int(min(56 << 20, max(32 << 20, int(1.5 * need))))

    flops = 2 * Bp * NP * (GL + 3 * NP) + 2 * Bp * (G + L + NP)     # 4 dots + rank-1
    bytes_accessed = 4 * Bp * (G + L) + 4 * Bp * GL + w_bytes + b_bytes + 12

    out = pl.pallas_call(
        functools.partial(_fusion_kernel, G=G, L=L, NP=NP),
        out_shape=jax.ShapeDtypeStruct((Bp, GL), jnp.float32),
        grid=grid,
        in_specs=[
            pl.BlockSpec(memory_space=pltpu.MemorySpace.SMEM),   # [3] confidence biases
            pl.BlockSpec((tb, G), lambda i: (i, 0)),             # global features (tiled)
            pl.BlockSpec((tb, L), lambda i: (i, 0)),             # local  features (tiled)
            pl.BlockSpec(memory_space=pltpu.MemorySpace.VMEM),   # weight slab, resident (1 copy)
            pl.BlockSpec(memory_space=pltpu.MemorySpace.VMEM),   # bias / rank-1 row slab
        ],
        out_specs=pl.BlockSpec((tb, GL), lambda i: (i, 0)),
        compiler_params=pltpu.CompilerParams(
            dimension_semantics=("parallel",),
            vmem_limit_bytes=vmem_limit),
        cost_estimate=pl.CostEstimate(flops=int(flops),
                                      transcendentals=int(3 * Bp),
                                      bytes_accessed=int(bytes_accessed)),
    )(scal, gf, lf, W, Bm)

    return out if Bp == B else out[:B]


# ----------------------------------------------------------------------------
# Pure-JAX reference mirroring the PyTorch forward exactly
# ----------------------------------------------------------------------------
def reference(gf, lf, p):
    relu, sig = jax.nn.relu, jax.nn.sigmoid
    rg = relu(gf @ p["wg1"] + p["bg1"]) @ p["wg2"] + p["bg2"]
    gc = sig(gf @ p["wgc"] + p["bgc"])
    rl = relu(lf @ p["wl1"] + p["bl1"]) @ p["wl2"] + p["bl2"]
    lc = sig(lf @ p["wlc"] + p["blc"])
    combined = jnp.concatenate([rg, rl], axis=-1)
    rc = sig(combined @ p["wrc"] + p["brc"])
    fusion_in = jnp.concatenate([rg, rl, gc, lc, rc], axis=-1)
    return relu(fusion_in @ p["wf1"] + p["bf1"]) @ p["wf2"] + p["bf2"]


if __name__ == "__main__":
    B, G, L = 16, 32, 32
    key = jax.random.PRNGKey(0)
    kg, kl, kp = jax.random.split(key, 3)
    global_features = jax.random.normal(kg, (B, G), jnp.float32)
    local_features = jax.random.normal(kl, (B, L), jnp.float32)

    params = init_params(kp, G, L)
    ref = reference(global_features, local_features, params)

    # --- exact-path check: f32 weight slab, tight tolerance ---
    packed_f32 = pack_params(params, G, L, weight_dtype=jnp.float32)
    validate_packed(packed_f32, G, L)
    out_f32 = jax.block_until_ready(
        feature_fusion(global_features, local_features, packed_f32))
    assert out_f32.shape == (B, G + L)
    assert jnp.allclose(out_f32, ref, atol=1e-3, rtol=1e-3), \
        "f32 kernel mismatch vs JAX reference"

    # --- production path: bf16 weight slab (f32 accumulation), bf16 tolerance ---
    packed_bf16 = pack_params(params, G, L, weight_dtype=jnp.bfloat16)
    validate_packed(packed_bf16, G, L)
    out_bf16 = jax.block_until_ready(
        feature_fusion(global_features, local_features, packed_bf16))
    assert out_bf16.shape == (B, G + L)
    assert jnp.allclose(out_bf16, ref, atol=1e-1, rtol=1e-1), \
        "bf16 kernel mismatch vs JAX reference"

    print("KERNEL_OK")
</pallas_src>

<mosaic_0001>
module attributes {stable_mosaic.version = 11 : i64} {
  func.func @_fusion_kernel(%arg0: i32, %arg1: memref<3xf32, #tpu.memory_space<smem>>, %arg2: memref<16x32xf32, #tpu.memory_space<vmem>>, %arg3: memref<16x32xf32, #tpu.memory_space<vmem>>, %arg4: memref<512x128xf32, #tpu.memory_space<vmem>>, %arg5: memref<16x128xf32, #tpu.memory_space<vmem>>, %arg6: memref<16x64xf32, #tpu.memory_space<vmem>>) attributes {dimension_semantics = [#tpu.dimension_semantics<parallel>], iteration_bounds = array<i64: 1>, scalar_prefetch = 0 : i64, scratch_operands = 0 : i64, tpu.core_type = #tpu.core_type<tc>, window_params = [{transform_indices = @transform_0, window_bounds = array<i64: 3>}, {transform_indices = @transform_1, window_bounds = array<i64: 16, 32>}, {transform_indices = @transform_2, window_bounds = array<i64: 16, 32>}, {pipeline_mode = #tpu.pipeline_mode<synchronous>, transform_indices = @transform_3, window_bounds = array<i64: 512, 128>}, {pipeline_mode = #tpu.pipeline_mode<synchronous>, transform_indices = @transform_4, window_bounds = array<i64: 16, 128>}, {transform_indices = @transform_5, window_bounds = array<i64: 16, 64>}]} {
    %c0 = arith.constant 0 : index
    %c0_0 = arith.constant 0 : index
    %0 = vector.load %arg2[%c0, %c0_0] : memref<16x32xf32, #tpu.memory_space<vmem>>, vector<16x32xf32>
    %c0_1 = arith.constant 0 : index
    %c0_2 = arith.constant 0 : index
    %1 = vector.load %arg3[%c0_1, %c0_2] : memref<16x32xf32, #tpu.memory_space<vmem>>, vector<16x32xf32>
    %c0_3 = arith.constant 0 : index
    %c0_4 = arith.constant 0 : index
    %2 = vector.load %arg4[%c0_3, %c0_4] : memref<512x128xf32, #tpu.memory_space<vmem>>, vector<32x128xf32>
    %cst = arith.constant dense<0.000000e+00> : vector<16x128xf32>
    %3 = tpu.matmul %0, %2, %cst {dimension_numbers = #tpu.dot_dimension_numbers<[1], [0], [0], [1], [0, 0, 1, 1], [], []>} : vector<16x32xf32>, vector<32x128xf32>, vector<16x128xf32> -> vector<16x128xf32>
    %c32 = arith.constant 32 : index
    %c0_5 = arith.constant 0 : index
    %4 = vector.load %arg4[%c32, %c0_5] : memref<512x128xf32, #tpu.memory_space<vmem>>, vector<32x128xf32>
    %cst_6 = arith.constant dense<0.000000e+00> : vector<16x128xf32>
    %5 = tpu.matmul %1, %4, %cst_6 {dimension_numbers = #tpu.dot_dimension_numbers<[1], [0], [0], [1], [0, 0, 1, 1], [], []>} : vector<16x32xf32>, vector<32x128xf32>, vector<16x128xf32> -> vector<16x128xf32>
    %6 = arith.addf %3, %5 : vector<16x128xf32>
    %c0_7 = arith.constant 0 : index
    %c0_8 = arith.constant 0 : index
    %7 = vector.load %arg5[%c0_7, %c0_8] : memref<16x128xf32, #tpu.memory_space<vmem>>, vector<1x128xf32>
    %8 = vector.broadcast %7 : vector<1x128xf32> to vector<16x128xf32>
    %9 = arith.addf %6, %8 : vector<16x128xf32>
    %cst_9 = arith.constant 0.000000e+00 : f32
    %10 = vector.broadcast %cst_9 : f32 to vector<16x128xf32>
    %11 = arith.maximumf %9, %10 : vector<16x128xf32>
    %c128 = arith.constant 128 : index
    %c0_10 = arith.constant 0 : index
    %12 = vector.load %arg4[%c128, %c0_10] : memref<512x128xf32, #tpu.memory_space<vmem>>, vector<128x128xf32>
    %cst_11 = arith.constant dense<0.000000e+00> : vector<16x128xf32>
    %13 = tpu.matmul %11, %12, %cst_11 {dimension_numbers = #tpu.dot_dimension_numbers<[1], [0], [0], [1], [0, 0, 1, 1], [], []>} : vector<16x128xf32>, vector<128x128xf32>, vector<16x128xf32> -> vector<16x128xf32>
    %c1 = arith.constant 1 : index
    %c0_12 = arith.constant 0 : index
    %14 = vector.load %arg5[%c1, %c0_12] : memref<16x128xf32, #tpu.memory_space<vmem>>, vector<1x128xf32>
    %15 = vector.broadcast %14 : vector<1x128xf32> to vector<16x128xf32>
    %16 = arith.addf %13, %15 : vector<16x128xf32>
    %c8 = arith.constant 8 : index
    %c0_13 = arith.constant 0 : index
    %17 = vector.load %arg5[%c8, %c0_13] : memref<16x128xf32, #tpu.memory_space<vmem>>, vector<1x32xf32>
    %18 = vector.broadcast %17 : vector<1x32xf32> to vector<16x32xf32>
    %19 = arith.mulf %0, %18 : vector<16x32xf32>
    %cst_14 = arith.constant dense<0.000000e+00> : vector<16xf32>
    %20 = vector.multi_reduction <add>, %19, %cst_14 [1] : vector<16x32xf32> to vector<16xf32>
    %21 = vector.shape_cast %20 : vector<16xf32> to vector<16x1xf32>
    %c0_15 = arith.constant 0 : index
    %22 = memref.load %arg1[%c0_15] : memref<3xf32, #tpu.memory_space<smem>>
    %23 = vector.broadcast %22 : f32 to vector<16x1xf32>
    %24 = arith.addf %21, %23 : vector<16x1xf32>
    %25 = arith.negf %24 : vector<16x1xf32>
    %26 = math.exp %25 : vector<16x1xf32>
    %cst_16 = arith.constant 1.000000e+00 : f32
    %27 = vector.broadcast %cst_16 : f32 to vector<16x1xf32>
    %28 = arith.addf %27, %26 : vector<16x1xf32>
    %29 = arith.divf %27, %28 : vector<16x1xf32>
    %c9 = arith.constant 9 : index
    %c0_17 = arith.constant 0 : index
    %30 = vector.load %arg5[%c9, %c0_17] : memref<16x128xf32, #tpu.memory_space<vmem>>, vector<1x32xf32>
    %31 = vector.broadcast %30 : vector<1x32xf32> to vector<16x32xf32>
    %32 = arith.mulf %1, %31 : vector<16x32xf32>
    %cst_18 = arith.constant dense<0.000000e+00> : vector<16xf32>
    %33 = vector.multi_reduction <add>, %32, %cst_18 [1] : vector<16x32xf32> to vector<16xf32>
    %34 = vector.shape_cast %33 : vector<16xf32> to vector<16x1xf32>
    %c1_19 = arith.constant 1 : index
    %35 = memref.load %arg1[%c1_19] : memref<3xf32, #tpu.memory_space<smem>>
    %36 = vector.broadcast %35 : f32 to vector<16x1xf32>
    %37 = arith.addf %34, %36 : vector<16x1xf32>
    %38 = arith.negf %37 : vector<16x1xf32>
    %39 = math.exp %38 : vector<16x1xf32>
    %cst_20 = arith.constant 1.000000e+00 : f32
    %40 = vector.broadcast %cst_20 : f32 to vector<16x1xf32>
    %41 = arith.addf %40, %39 : vector<16x1xf32>
    %42 = arith.divf %40, %41 : vector<16x1xf32>
    %c7 = arith.constant 7 : index
    %c0_21 = arith.constant 0 : index
    %43 = vector.load %arg5[%c7, %c0_21] : memref<16x128xf32, #tpu.memory_space<vmem>>, vector<1x128xf32>
    %44 = vector.broadcast %43 : vector<1x128xf32> to vector<16x128xf32>
    %45 = arith.mulf %16, %44 : vector<16x128xf32>
    %cst_22 = arith.constant dense<0.000000e+00> : vector<16xf32>
    %46 = vector.multi_reduction <add>, %45, %cst_22 [1] : vector<16x128xf32> to vector<16xf32>
    %47 = vector.shape_cast %46 : vector<16xf32> to vector<16x1xf32>
    %c2 = arith.constant 2 : index
    %48 = memref.load %arg1[%c2] : memref<3xf32, #tpu.memory_space<smem>>
    %49 = vector.broadcast %48 : f32 to vector<16x1xf32>
    %50 = arith.addf %47, %49 : vector<16x1xf32>
    %51 = arith.negf %50 : vector<16x1xf32>
    %52 = math.exp %51 : vector<16x1xf32>
    %cst_23 = arith.constant 1.000000e+00 : f32
    %53 = vector.broadcast %cst_23 : f32 to vector<16x1xf32>
    %54 = arith.addf %53, %52 : vector<16x1xf32>
    %55 = arith.divf %53, %54 : vector<16x1xf32>
    %c256 = arith.constant 256 : index
    %c0_24 = arith.constant 0 : index
    %56 = vector.load %arg4[%c256, %c0_24] : memref<512x128xf32, #tpu.memory_space<vmem>>, vector<128x128xf32>
    %cst_25 = arith.constant dense<0.000000e+00> : vector<16x128xf32>
    %57 = tpu.matmul %16, %56, %cst_25 {dimension_numbers = #tpu.dot_dimension_numbers<[1], [0], [0], [1], [0, 0, 1, 1], [], []>} : vector<16x128xf32>, vector<128x128xf32>, vector<16x128xf32> -> vector<16x128xf32>
    %c2_26 = arith.constant 2 : index
    %c0_27 = arith.constant 0 : index
    %58 = vector.load %arg5[%c2_26, %c0_27] : memref<16x128xf32, #tpu.memory_space<vmem>>, vector<1x128xf32>
    %59 = vector.broadcast %58 : vector<1x128xf32> to vector<16x128xf32>
    %60 = arith.addf %57, %59 : vector<16x128xf32>
    %c4 = arith.constant 4 : index
    %c0_28 = arith.constant 0 : index
    %61 = vector.load %arg5[%c4, %c0_28] : memref<16x128xf32, #tpu.memory_space<vmem>>, vector<3x128xf32>
    %62 = vector.extract_strided_slice %61 {offsets = [0, 0], sizes = [1, 128], strides = [1, 1]} : vector<3x128xf32> to vector<1x128xf32>
    %63 = vector.broadcast %29 : vector<16x1xf32> to vector<16x128xf32>
    %64 = vector.broadcast %62 : vector<1x128xf32> to vector<16x128xf32>
    %65 = arith.mulf %63, %64 : vector<16x128xf32>
    %66 = arith.addf %60, %65 : vector<16x128xf32>
    %67 = vector.extract_strided_slice %61 {offsets = [1, 0], sizes = [1, 128], strides = [1, 1]} : vector<3x128xf32> to vector<1x128xf32>
    %68 = vector.broadcast %42 : vector<16x1xf32> to vector<16x128xf32>
    %69 = vector.broadcast %67 : vector<1x128xf32> to vector<16x128xf32>
    %70 = arith.mulf %68, %69 : vector<16x128xf32>
    %71 = arith.addf %66, %70 : vector<16x128xf32>
    %72 = vector.extract_strided_slice %61 {offsets = [2, 0], sizes = [1, 128], strides = [1, 1]} : vector<3x128xf32> to vector<1x128xf32>
    %73 = vector.broadcast %55 : vector<16x1xf32> to vector<16x128xf32>
    %74 = vector.broadcast %72 : vector<1x128xf32> to vector<16x128xf32>
    %75 = arith.mulf %73, %74 : vector<16x128xf32>
    %76 = arith.addf %71, %75 : vector<16x128xf32>
    %cst_29 = arith.constant 0.000000e+00 : f32
    %77 = vector.broadcast %cst_29 : f32 to vector<16x128xf32>
    %78 = arith.maximumf %76, %77 : vector<16x128xf32>
    %c384 = arith.constant 384 : index
    %c0_30 = arith.constant 0 : index
    %79 = vector.load %arg4[%c384, %c0_30] : memref<512x128xf32, #tpu.memory_space<vmem>>, vector<128x128xf32>
    %cst_31 = arith.constant dense<0.000000e+00> : vector<16x128xf32>
    %80 = tpu.matmul %78, %79, %cst_31 {dimension_numbers = #tpu.dot_dimension_numbers<[1], [0], [0], [1], [0, 0, 1, 1], [], []>} : vector<16x128xf32>, vector<128x128xf32>, vector<16x128xf32> -> vector<16x128xf32>
    %c3 = arith.constant 3 : index
    %c0_32 = arith.constant 0 : index
    %81 = vector.load %arg5[%c3, %c0_32] : memref<16x128xf32, #tpu.memory_space<vmem>>, vector<1x128xf32>
    %82 = vector.broadcast %81 : vector<1x128xf32> to vector<16x128xf32>
    %83 = arith.addf %80, %82 : vector<16x128xf32>
    %84 = vector.extract_strided_slice %83 {offsets = [0, 0], sizes = [16, 64], strides = [1, 1]} : vector<16x128xf32> to vector<16x64xf32>
    %c0_33 = arith.constant 0 : index
    %c0_34 = arith.constant 0 : index
    %85 = vector.load %arg6[%c0_33, %c0_34] : memref<16x64xf32, #tpu.memory_space<vmem>>, vector<16x64xf32>
    tpu.vector_store %arg6[%c0_33, %c0_34], %84 {strides = array<i32>} : memref<16x64xf32, #tpu.memory_space<vmem>>, vector<16x64xf32>,
    return
  }
  func.func @transform_0(%arg0: i32) -> i32 {
    %c0_i32 = arith.constant 0 : i32
    %c0_i32_0 = arith.constant 0 : i32
    return %c0_i32 : i32
  }
  func.func @transform_1(%arg0: i32) -> (i32, i32) {
    %c0_i32 = arith.constant 0 : i32
    %c0_i32_0 = arith.constant 0 : i32
    return %arg0, %c0_i32 : i32, i32
  }
  func.func @transform_2(%arg0: i32) -> (i32, i32) {
    %c0_i32 = arith.constant 0 : i32
    %c0_i32_0 = arith.constant 0 : i32
    return %arg0, %c0_i32 : i32, i32
  }
  func.func @transform_3(%arg0: i32) -> (i32, i32) {
    %c0_i32 = arith.constant 0 : i32
    %c0_i32_0 = arith.constant 0 : i32
    %c0_i32_1 = arith.constant 0 : i32
    return %c0_i32, %c0_i32_0 : i32, i32
  }
  func.func @transform_4(%arg0: i32) -> (i32, i32) {
    %c0_i32 = arith.constant 0 : i32
    %c0_i32_0 = arith.constant 0 : i32
    %c0_i32_1 = arith.constant 0 : i32
    return %c0_i32, %c0_i32_0 : i32, i32
  }
  func.func @transform_5(%arg0: i32) -> (i32, i32) {
    %c0_i32 = arith.constant 0 : i32
    %c0_i32_0 = arith.constant 0 : i32
    return %arg0, %c0_i32 : i32, i32
  }
}

</mosaic_0001>

<bundles_post_ra>
// kernel: tpu_custom_call.1
= control target key start
LH: loop header
LB: loop body
LE: loop exit
PB: predicated region body
PF: predicated region fallthrough
CT: control target
= control target key end

     0   :  { %10 = vsyncpa [#allocation5], 0  ;;  %s1323_s0 = inlined_call_operand.hbm [shape: f32[3], index: 0, kind: input, shape index: {}]   ;;  %s1324_s1 = inlined_call_operand.hbm [shape: f32[16,32], index: 1, kind: input, shape index: {}]   ;;  %s1325_s2 = inlined_call_operand.hbm [shape: f32[16,32], index: 2, kind: input, shape index: {}]   ;;  %s1326_s3 = inlined_call_operand.hbm [shape: f32[512,128], index: 3, kind: input, shape index: {}]   ;;  %s1327_s4 = inlined_call_operand.hbm [shape: f32[16,128], index: 4, kind: input, shape index: {}]   ;;  %s1328_s5 = inlined_call_operand.hbm [shape: f32[16,64], index: 5, kind: output, shape index: {}]  }
   0x1   :  { %11 = vsyncpa [#allocation3], 0 }
   0x2   :  { %12 = vsyncpa [#allocation8], 0 }
   0x3   :  { %13 = vsyncpa [#allocation11], 0 }
   0x4   :  { %14 = vsyncpa [#allocation4], 0  ;;  %s1182_s18 = smov [#allocation7]   ;;  %s1183_s20 = smov [#allocation6]  }
   0x5   :  { %s40_s19 = sshll.u32 %s1182_s18, 4  ;;  %s28_s21 = sshll.u32 %s1183_s20, 4  ;;  %s41_s19 = int_to_ptr.vmem [resolvable:$true] %s40_s19  ;;  %s29_s21 = int_to_ptr.vmem [resolvable:$true] %s28_s21 }
   0x6   :  { %s1052_s24 = scalar_lea.hbm %s1325_s2, 256 }
   0x7   :  { %p1053_p0 = scmp.ne.s32.totalorder %s1325_s2, %s1052_s24  ;;  %p1056_p1 = scmp.lt.u32.totalorder %s1052_s24, %s1325_s2 }
   0x9   :  { %p1058_p2 = pnand %p1056_p1, %p1053_p0 }
   0xb   :  { %1061 = shalt.err (!%p1058_p2)
}
   0xc   :  { %s1062_s29 = scalar_lea.vmem %s41_s19, 256  ;;  %p1067_p4 = scmp.lt.s32.totalorder %s41_s19, %s41_s19 }
   0xd   :  { %p1063_p3 = scmp.ne.s32.totalorder %s41_s19, %s1062_s29  ;;  %p1068_p5 = scmp.lt.s32.totalorder %s1062_s29, %s1062_s29 }
   0xf   :  { %p1069_p6 = por %p1068_p5, %p1067_p4 }
  0x11   :  { %p1070_p7 = pnand %p1069_p6, %p1063_p3 }
  0x13   :  { %1073 = shalt.err (!%p1070_p7)
}
  0x14   :  { %s1184_s30 = smov 128   ;;  %s1185_s6 = smov 8  }
  0x15   :  { %46 = dma.hbm_to_vmem [thread:$0]  %s1325_s2, 256, %s41_s19, [#allocation8], %s1184_s30, %s1184_s30, %s1185_s6  }
  0x16   :  { %s1074_s11 = scalar_lea.hbm %s1323_s0, 16 }
  0x17   :  { %p1075_p8 = scmp.ne.s32.totalorder %s1323_s0, %s1074_s11  ;;  %p1078_p9 = scmp.lt.u32.totalorder %s1074_s11, %s1323_s0 }
  0x19   :  { %p1080_p10 = pnand %p1078_p9, %p1075_p8 }
  0x1b   :  { %1083 = shalt.err (!%p1080_p10)
}
  0x1c   :  { %s1186_s16 = smov [#allocation2]   ;;  %s1084_s20 = scalar_lea.hbm %s1324_s1, 256 }
  0x1d   :  { %22 = dma.hbm_to_smem %s1323_s0, 16, %s1186_s16, [#allocation5]  }
  0x1e   :  { %p1085_p11 = scmp.ne.s32.totalorder %s1324_s1, %s1084_s20  ;;  %p1088_p12 = scmp.lt.u32.totalorder %s1084_s20, %s1324_s1 }
  0x20   :  { %p1090_p13 = pnand %p1088_p12, %p1085_p11 }
  0x22   :  { %1093 = shalt.err (!%p1090_p13)
}
  0x23   :  { %s1094_s26 = scalar_lea.vmem %s29_s21, 256  ;;  %p1099_p1 = scmp.lt.s32.totalorder %s29_s21, %s29_s21 }
  0x24   :  { %p1095_p0 = scmp.ne.s32.totalorder %s29_s21, %s1094_s26  ;;  %p1100_p2 = scmp.lt.s32.totalorder %s1094_s26, %s1094_s26 }
  0x26   :  { %p1101_p3 = por %p1100_p2, %p1099_p1 }
  0x28   :  { %p1102_p4 = pnand %p1101_p3, %p1095_p0 }
  0x2a   :  { %1105 = shalt.err (!%p1102_p4)
}
  0x2b   :  { %34 = dma.hbm_to_vmem [thread:$0]  %s1324_s1, 256, %s29_s21, [#allocation3], %s1184_s30, %s1184_s30, %s1185_s6  }
  0x2c   :  { %s1187_s28 = smov [#allocation9]   ;;  %s1188_s7 = smov [#allocation10]  }
  0x2d   :  { %s52_s29 = sshll.u32 %s1187_s28, 4  ;;  %s64_s8 = sshll.u32 %s1188_s7, 4  ;;  %s53_s29 = int_to_ptr.vmem [resolvable:$true] %s52_s29  ;;  %s65_s8 = int_to_ptr.vmem [resolvable:$true] %s64_s8 }
  0x2e   :  { %s1106_s11 = scalar_lea.hbm %s1326_s3, 8192 }
  0x2f   :  { %p1107_p5 = scmp.ne.s32.totalorder %s1326_s3, %s1106_s11  ;;  %p1110_p6 = scmp.lt.u32.totalorder %s1106_s11, %s1326_s3 }
  0x31   :  { %p1112_p7 = pnand %p1110_p6, %p1107_p5 }
  0x33   :  { %1115 = shalt.err (!%p1112_p7)
}
  0x34   :  { %s1116_s1 = scalar_lea.vmem %s53_s29, 8192  ;;  %p1121_p9 = scmp.lt.s32.totalorder %s53_s29, %s53_s29 }
  0x35   :  { %p1117_p8 = scmp.ne.s32.totalorder %s53_s29, %s1116_s1  ;;  %p1122_p10 = scmp.lt.s32.totalorder %s1116_s1, %s1116_s1 }
  0x37   :  { %p1123_p11 = por %p1122_p10, %p1121_p9 }
  0x39   :  { %p1124_p12 = pnand %p1123_p11, %p1117_p8 }
  0x3b   :  { %1127 = shalt.err (!%p1124_p12)
}
  0x3c   :  { %58 = dma.hbm_to_vmem [thread:$0]  %s1326_s3, 8192, %s53_s29, [#allocation8], %s1184_s30, %s1184_s30, %s1185_s6  }
  0x3d   :  { %s1128_s2 = scalar_lea.hbm %s1327_s4, 256 }
  0x3e   :  { %p1129_p13 = scmp.ne.s32.totalorder %s1327_s4, %s1128_s2  ;;  %p1132_p0 = scmp.lt.u32.totalorder %s1128_s2, %s1327_s4 }
  0x40   :  { %p1134_p1 = pnand %p1132_p0, %p1129_p13 }
  0x42   :  { %1137 = shalt.err (!%p1134_p1)
}
  0x43   :  { %s1138_s24 = scalar_lea.vmem %s65_s8, 256  ;;  %p1143_p3 = scmp.lt.s32.totalorder %s65_s8, %s65_s8 }
  0x44   :  { %p1139_p2 = scmp.ne.s32.totalorder %s65_s8, %s1138_s24  ;;  %p1144_p4 = scmp.lt.s32.totalorder %s1138_s24, %s1138_s24 }
  0x46   :  { %p1145_p5 = por %p1144_p4, %p1143_p3 }
  0x48   :  { %p1146_p6 = pnand %p1145_p5, %p1139_p2 }
  0x4a   :  { %1149 = shalt.err (!%p1146_p6)
}
  0x4b   :  { %70 = dma.hbm_to_vmem [thread:$0]  %s1327_s4, 256, %s65_s8, [#allocation11], %s1184_s30, %s1184_s30, %s1185_s6  }
  0x4c   :  { %1172 = dma.done.wait [#allocation5], 16  }
  0x4d   :  { %1173 = vsyncadd [#allocation5], 4294967280 }
  0x4e   :  { %1174 = dma.done.wait [#allocation3], 256  }
  0x4f   :  { %1175 = vsyncadd [#allocation3], 4294967040 }
  0x50   :  { %1176 = dma.done.wait [#allocation8], 8448  }
  0x51   :  { %1177 = vsyncadd [#allocation8], 4294958848 }
  0x52   :  { %1178 = dma.done.wait [#allocation11], 256  }
  0x53   :  { %1179 = vsyncadd [#allocation11], 4294967040 }
  0x54   :  { %86 = sfence }
  0x55   :  { %v95_v0 = vld [vmem:[#allocation9 + $0x20] sm:$0xff]  ;;  %v96_v1 = vld [vmem:[#allocation9 + $0x28] sm:$0xff]  ;;  %v97_v2 = vld [vmem:[#allocation9 + $0x30] sm:$0xff]  ;;  %vm99_vm0 = vcmask 261120   ;;  %s380_s4 = sld [smem:[#allocation2]]  ;;  %s704_s26 = sld [smem:[#allocation2 + $0x1]] }
  0x56   :  { %v906_v3 = vpack.c.bf16 %v96_v1, %v95_v0  ;;  %v98_v4 = vld [vmem:[#allocation9 + $0x38] sm:$0xff]  ;;  %v89_v5 = vld [vmem:[#allocation7] sm:$0xff]  ;;  %v91_v7 = vld [vmem:[#allocation9] sm:$0xff]  ;;  %s708_s0 = sld [smem:[#allocation2 + $0x2]]  ;;  %s1189_s27 = smov [#allocation12]   ;;  %vm671_vm1 = vcmask 523264  }
  0x57   :  { %v910_v6 = vpack.c.bf16 %v98_v4, %v97_v2  ;;  %787 = vmatprep.mubr.msk.f32.mxu0 %vm99_vm0, %v89_v5  ;;  %v92_v8 = vld [vmem:[#allocation9 + $0x8] sm:$0xff]  ;;  %v271_v9 = vld [vmem:[#allocation9 + $0x80] sm:$0xff]  ;;  %v273_v13 = vld [vmem:[#allocation9 + $0x90] sm:$0xff]  ;;  %s679_s28 = sshll.u32 %s1189_s27, 4  ;;  %s680_s28 = int_to_ptr.vmem [resolvable:$true] %s679_s28 }
  0x58   :  { %907 = vmatprep.subr.bf16.mxu0 %v906_v3  ;;  %v272_v10 = vld [vmem:[#allocation9 + $0x88] sm:$0xff]  ;;  %v914_v11 = vpack.c.bf16 %v92_v8, %v91_v7  ;;  %v274_v14 = vld [vmem:[#allocation9 + $0x98] sm:$0xff]  ;;  %v93_v15 = vld [vmem:[#allocation9 + $0x10] sm:$0xff]  ;;  %s1150_s29 = scalar_lea.vmem %s680_s28, 256  ;;  %p1155_p8 = scmp.lt.s32.totalorder %s680_s28, %s680_s28 }
  0x59   :  { %909 = vmatpush3.bf16.msra.mxu0 %v906_v3  ;;  %v922_v12 = vpack.c.bf16 %v272_v10, %v271_v9  ;;  %v94_v16 = vld [vmem:[#allocation9 + $0x18] sm:$0xff]  ;;  %v926_v17 = vpack.c.bf16 %v274_v14, %v273_v13  ;;  %v275_v18 = vld [vmem:[#allocation9 + $0xa0] sm:$0xff]  ;;  %v276_v19 = vld [vmem:[#allocation9 + $0xa8] sm:$0xff]  ;;  %p1151_p7 = scmp.ne.s32.totalorder %s680_s28, %s1150_s29  ;;  %p1156_p9 = scmp.lt.s32.totalorder %s1150_s29, %s1150_s29 }
  0x5a   :  { %911 = vmatprep.subr.bf16.mxu0 %v910_v6  ;;  %v1293_v20 = vld [vmem:[#allocation7 + $0x8] sm:$0xff]  ;;  %v918_v21 = vpack.c.bf16 %v94_v16, %v93_v15  ;;  %v87_v22 = vld [vmem:[#allocation6] sm:$0xff]  ;;  %v930_v23 = vpack.c.bf16 %v276_v19, %v275_v18  ;;  %v277_v24 = vld [vmem:[#allocation9 + $0xb0] sm:$0xff] }
  0x5b   :  { %923 = vmatprep.subr.bf16.mxu1 %v922_v12  ;;  %v278_v25 = vld [vmem:[#allocation9 + $0xb8] sm:$0xff]  ;;  %v279_v27 = vld [vmem:[#allocation9 + $0xc0] sm:$0xff]  ;;  %v280_v28 = vld [vmem:[#allocation9 + $0xc8] sm:$0xff]  ;;  %p1157_p10 = por %p1156_p9, %p1155_p8 }
  0x5c   :  { %925 = vmatpush3.bf16.msra.mxu1 %v922_v12  ;;  %v934_v26 = vpack.c.bf16 %v278_v25, %v277_v24  ;;  %v1298_v29 = vld [vmem:[#allocation6 + $0x8] sm:$0xff]  ;;  %v938_v30 = vpack.c.bf16 %v280_v28, %v279_v27  ;;  %v281_v31 = vld [vmem:[#allocation9 + $0xd0] sm:$0xff]  ;;  %v282_v32 = vld [vmem:[#allocation9 + $0xd8] sm:$0xff] }
  0x5d   :  { %913 = vmatpush3.bf16.msra.mxu0 %v910_v6  ;;  %927 = vmatprep.subr.bf16.mxu1 %v926_v17  ;;  %v942_v33 = vpack.c.bf16 %v282_v32, %v281_v31  ;;  %v283_v34 = vld [vmem:[#allocation9 + $0xe0] sm:$0xff]  ;;  %v284_v35 = vld [vmem:[#allocation9 + $0xe8] sm:$0xff]  ;;  %v285_v38 = vld [vmem:[#allocation9 + $0xf0] sm:$0xff]  ;;  %p1158_p11 = pnand %p1157_p10, %p1151_p7 }
  0x5e   :  { %915 = vmatprep.subr.bf16.mxu0 %v914_v11  ;;  %v946_v36 = vpack.c.bf16 %v284_v35, %v283_v34  ;;  %v703_v37 = vld [vmem:[#allocation10 + $0x9] ss:$0 sm:$0xff]  ;;  %v286_v39 = vld [vmem:[#allocation9 + $0xf8] sm:$0xff]  ;;  %v452_v42 = vld [vmem:[#allocation9 + $0x100] sm:$0xff] }
  0x5f   :  { %v950_v40 = vpack.c.bf16 %v286_v39, %v285_v38  ;;  %v401_v41 = vmul.f32 %v703_v37, %v89_v5  ;;  %v453_v43 = vld [vmem:[#allocation9 + $0x108] sm:$0xff]  ;;  %v454_v44 = vld [vmem:[#allocation9 + $0x110] sm:$0xff]  ;;  %v455_v47 = vld [vmem:[#allocation9 + $0x118] sm:$0xff]  ;;  %v402_v10 = vmul.f32 %v703_v37, %v1293_v20 }
  0x60   :  { %788 = vmatmul.mubr.msk.f32.vlgmr.msra.gmra.mrb[0].mxu0 %vm99_vm0, %v1293_v20  ;;  %929 = vmatpush3.bf16.msra.mxu1 %v926_v17  ;;  %v954_v46 = vpack.c.bf16 %v453_v43, %v452_v42  ;;  %v958_v48 = vpack.c.bf16 %v455_v47, %v454_v44  ;;  %v456_v49 = vld [vmem:[#allocation9 + $0x120] sm:$0xff]  ;;  %v457_v50 = vld [vmem:[#allocation9 + $0x128] sm:$0xff]  ;;  %v458_v54 = vld [vmem:[#allocation9 + $0x130] sm:$0xff] }
  0x61   :  { %917 = vmatpush3.bf16.msra.mxu0 %v914_v11  ;;  %798 = vmatprep.mubr.msk.f32.mxu0 %vm99_vm0, %v87_v22  ;;  %v403_v45 = vsel %vm99_vm0, %v401_v41, 0.0  ;;  %v700_v51 = vld [vmem:[#allocation10 + $0x8] ss:$0 sm:$0xff]  ;;  %v962_v52 = vpack.c.bf16 %v457_v50, %v456_v49  ;;  %v459_v55 = vld [vmem:[#allocation9 + $0x138] sm:$0xff]  ;;  %v460_v58 = vld [vmem:[#allocation9 + $0x140] sm:$0xff]  ;;  %v406_v15 = vsel %vm99_vm0, %v402_v10, 0.0 }
  0x62   :  { %919 = vmatprep.subr.bf16.mxu0 %v918_v21  ;;  %931 = vmatprep.subr.bf16.mxu1 %v930_v23  ;;  %v372_v53 = vmul.f32 %v700_v51, %v87_v22  ;;  %v966_v57 = vpack.c.bf16 %v459_v55, %v458_v54  ;;  %v461_v59 = vld [vmem:[#allocation9 + $0x148] sm:$0xff]  ;;  %v462_v61 = vld [vmem:[#allocation9 + $0x150] sm:$0xff]  ;;  %v463_v62 = vld [vmem:[#allocation9 + $0x158] sm:$0xff]  ;;  %v373_v14 = vmul.f32 %v700_v51, %v1298_v29  ;;  %v410_v55 = vstv %s704_s26 }
  0x63   :  { %404 = vadd.xlane.f32.xlu1 %v403_v45  ;;  %v970_v60 = vpack.c.bf16 %v461_v59, %v460_v58  ;;  %v974_v63 = vpack.c.bf16 %v463_v62, %v462_v61  ;;  %v464_v0 = vld [vmem:[#allocation9 + $0x160] sm:$0xff]  ;;  %v465_v1 = vld [vmem:[#allocation9 + $0x168] sm:$0xff]  ;;  %v466_v11 = vld [vmem:[#allocation9 + $0x170] sm:$0xff]  ;;  %v437_v58 = vstv %s708_s0 }
  0x64   :  { %933 = vmatpush3.bf16.msra.mxu1 %v930_v23  ;;  %v374_v56 = vsel %vm99_vm0, %v372_v53, 0.0  ;;  %v978_v2 = vpack.c.bf16 %v465_v1, %v464_v0  ;;  %v698_v3 = vld [vmem:[#allocation10] ss:$0 sm:$0xff]  ;;  %v467_v12 = vld [vmem:[#allocation9 + $0x178] sm:$0xff]  ;;  %v377_v16 = vsel %vm99_vm0, %v373_v14, 0.0  ;;  %v577_v27 = vld [vmem:[#allocation9 + $0x190] sm:$0xff]  ;;  %v381_v53 = vstv %s380_s4 }
  0x65   :  { %921 = vmatpush3.bf16.msra.mxu0 %v918_v21  ;;  %935 = vmatprep.subr.bf16.mxu1 %v934_v26  ;;  %v982_v13 = vpack.c.bf16 %v467_v12, %v466_v11  ;;  %v699_v17 = vld [vmem:[#allocation10 + $0x1] ss:$0 sm:$0xff]  ;;  %v707_v19 = vld [vmem:[#allocation10 + $0x7] ss:$0 sm:$0xff]  ;;  %v580_v32 = vld [vmem:[#allocation9 + $0x1a8] sm:$0xff] }
  0x66   :  { %955 = vmatprep.subr.bf16.mxu0 %v954_v46  ;;  %375 = vadd.xlane.f32.xlu0 %v374_v56  ;;  %v575_v25 = vld [vmem:[#allocation9 + $0x180] sm:$0xff]  ;;  %v581_v34 = vld [vmem:[#allocation9 + $0x1b0] sm:$0xff]  ;;  %v582_v35 = vld [vmem:[#allocation9 + $0x1b8] sm:$0xff] }
  0x67   :  { %407 = vadd.xlane.f32.xlu1 %v406_v15  ;;  %v579_v31 = vld [vmem:[#allocation9 + $0x1a0] sm:$0xff]  ;;  %v584_v38 = vld [vmem:[#allocation9 + $0x1c8] sm:$0xff]  ;;  %v586_v41 = vld [vmem:[#allocation9 + $0x1d8] sm:$0xff] }
  0x68   :  { %799 = vmatmul.mubr.msk.f32.vlgmr.msra.gmra.mrb[0].mxu0 %vm99_vm0, %v1298_v29  ;;  %937 = vmatpush3.bf16.msra.mxu1 %v934_v26  ;;  %v576_v26 = vld [vmem:[#allocation9 + $0x188] sm:$0xff]  ;;  %v578_v29 = vld [vmem:[#allocation9 + $0x198] sm:$0xff]  ;;  %v583_v37 = vld [vmem:[#allocation9 + $0x1c0] sm:$0xff] }
  0x69   :  { %939 = vmatprep.subr.bf16.mxu1 %v938_v30  ;;  %957 = vmatpush3.bf16.msra.mxu0 %v954_v46  ;;  %v986_v28 = vpack.c.bf16 %v576_v26, %v575_v25  ;;  %v1002_v39 = vpack.c.bf16 %v584_v38, %v583_v37  ;;  %v587_v43 = vld [vmem:[#allocation9 + $0x1e0] sm:$0xff]  ;;  %v588_v44 = vld [vmem:[#allocation9 + $0x1e8] sm:$0xff]  ;;  %v589_v46 = vld [vmem:[#allocation9 + $0x1f0] sm:$0xff] }
  0x6a   :  { %959 = vmatprep.subr.bf16.mxu0 %v958_v48  ;;  %378 = vadd.xlane.f32.xlu0 %v377_v16  ;;  %v1010_v45 = vpack.c.bf16 %v588_v44, %v587_v43  ;;  %v590_v47 = vld [vmem:[#allocation9 + $0x1f8] sm:$0xff]  ;;  %v549_v16 = vlaneseq }
  0x6c   :  { %941 = vmatpush3.bf16.msra.mxu1 %v938_v30  ;;  %v990_v30 = vpack.c.bf16 %v578_v29, %v577_v27  ;;  %v711_v27 = vld [vmem:[#allocation10 + $0x2] ss:$0 sm:$0xff] }
  0x6d   :  { %943 = vmatprep.subr.bf16.mxu1 %v942_v33  ;;  %961 = vmatpush3.bf16.msra.mxu0 %v958_v48  ;;  %v1014_v48 = vpack.c.bf16 %v590_v47, %v589_v46 }
  0x6e   :  { %963 = vmatprep.subr.bf16.mxu0 %v962_v52 }
  0x70   :  { %945 = vmatpush3.bf16.msra.mxu1 %v942_v33  ;;  %v994_v33 = vpack.c.bf16 %v580_v32, %v579_v31 }
  0x71   :  { %947 = vmatprep.subr.bf16.mxu1 %v946_v36  ;;  %965 = vmatpush3.bf16.msra.mxu0 %v962_v52 }
  0x72   :  { %967 = vmatprep.subr.bf16.mxu0 %v966_v57 }
  0x74   :  { %949 = vmatpush3.bf16.msra.mxu1 %v946_v36  ;;  %v998_v36 = vpack.c.bf16 %v582_v35, %v581_v34 }
  0x75   :  { %951 = vmatprep.subr.bf16.mxu1 %v950_v40  ;;  %969 = vmatpush3.bf16.msra.mxu0 %v966_v57 }
  0x76   :  { %971 = vmatprep.subr.bf16.mxu0 %v970_v60 }
  0x78   :  { %953 = vmatpush3.bf16.msra.mxu1 %v950_v40  ;;  %v585_v40 = vld [vmem:[#allocation9 + $0x1d0] sm:$0xff] }
  0x79   :  { %973 = vmatpush3.bf16.msra.mxu0 %v970_v60  ;;  %987 = vmatprep.subr.bf16.mxu1 %v986_v28  ;;  %v1006_v42 = vpack.c.bf16 %v586_v41, %v585_v40 }
  0x7a   :  { %975 = vmatprep.subr.bf16.mxu0 %v974_v63 }
  0x7d   :  { %977 = vmatpush3.bf16.msra.mxu0 %v974_v63 }
  0x7e   :  { %979 = vmatprep.subr.bf16.mxu0 %v978_v2 }
  0x81   :  { %981 = vmatpush3.bf16.msra.mxu0 %v978_v2 }
  0x82   :  { %983 = vmatprep.subr.bf16.mxu0 %v982_v13 }
  0x85   :  { %985 = vmatpush3.bf16.msra.mxu0 %v982_v13 }
  0xf0   :  { %v405_v49 = vpop.xlane.xlu1 %404 }
  0xf1   :  { %v411_v62 = vadd.f32 %v410_v55, %v405_v49 }
  0xf3   :  { %v376_v50 = vpop.xlane.xlu0 %375 }
  0xf4   :  { %v408_v51 = vpop.xlane.xlu1 %407  ;;  %v382_v57 = vadd.f32 %v381_v53, %v376_v50 }
  0xf5   :  { %v412_v56 = vadd.f32 %v410_v55, %v408_v51 }
  0xf6   :  { %v701_v1 = vmul.f32 -1.442695, %v382_v57 }
  0xf7   :  { %v379_v52 = vpop.xlane.xlu0 %378  ;;  %v706_v63 = vmul.f32 -1.442695, %v412_v56 }
  0xf8   :  { %v383_v54 = vadd.f32 %v381_v53, %v379_v52  ;;  %v712_v52 = vld [vmem:[#allocation10 + $0x3] ss:$0 sm:$0xff] }
  0xfa   :  { %v702_v60 = vmul.f32 -1.442695, %v383_v54 }
  0xfc   :  { %1028 = vpow2.f32 %v702_v60 }
  0xfd   :  { %1030 = vpow2.f32 %v706_v63 }
  0xfe   :  { %1032 = vpow2.f32 %v701_v1 }
 0x13b   :  { %v800_v4 = vpop.f32.mrb[0].mxu0 }
 0x13c   :  { %v268_v5 = vadd.f32 %v800_v4, %v698_v3  ;;  %v253_v6 = vpop.f32.mrb[1].mxu0 }
 0x13d   :  { %v267_v7 = vadd.f32 %v698_v3, %v253_v6  ;;  %v705_v3 = vmul.f32 -1.442695, %v411_v62  ;;  %v1029_v6 = vpop.eup %1028 }
 0x13e   :  { %v270_v9 = vmax.f32 %v268_v5, 0.0 }
 0x13f   :  { %v269_v8 = vmax.f32 %v267_v7, 0.0  ;;  %1034 = vpow2.f32 %v705_v3  ;;  %v1031_v7 = vpop.eup %1030 }
 0x140   :  { %v420_v11 = vadd.f32 1.0, %v1031_v7 }
 0x141   :  { %833 = vmatprep.mubr.f32.mxu1 %v269_v8  ;;  %v1033_v8 = vpop.eup %1032 }
 0x142   :  { %834 = vmatmul.mubr.f32.vlgmr.msra.gmra.mrb[0].mxu1 %v270_v9  ;;  %v391_v9 = vadd.f32 1.0, %v1029_v6  ;;  %v390_v13 = vadd.f32 1.0, %v1033_v8 }
 0x143   :  { %989 = vmatpush3.bf16.msra.mxu1 %v986_v28 }
 0x144   :  { %991 = vmatprep.subr.bf16.mxu1 %v990_v30 }
 0x147   :  { %993 = vmatpush3.bf16.msra.mxu1 %v990_v30 }
 0x148   :  { %995 = vmatprep.subr.bf16.mxu1 %v994_v33 }
 0x149   :  { %v1035_v10 = vpop.eup %1034 }
 0x14a   :  { %v419_v15 = vadd.f32 1.0, %v1035_v10 }
 0x14b   :  { %997 = vmatpush3.bf16.msra.mxu1 %v994_v33 }
 0x14c   :  { %999 = vmatprep.subr.bf16.mxu1 %v998_v36 }
 0x14f   :  { %1001 = vmatpush3.bf16.msra.mxu1 %v998_v36 }
 0x150   :  { %1003 = vmatprep.subr.bf16.mxu1 %v1002_v39 }
 0x153   :  { %1005 = vmatpush3.bf16.msra.mxu1 %v1002_v39 }
 0x154   :  { %1007 = vmatprep.subr.bf16.mxu1 %v1006_v42 }
 0x157   :  { %1009 = vmatpush3.bf16.msra.mxu1 %v1006_v42 }
 0x158   :  { %1011 = vmatprep.subr.bf16.mxu1 %v1010_v45 }
 0x15b   :  { %1013 = vmatpush3.bf16.msra.mxu1 %v1010_v45 }
 0x15c   :  { %1015 = vmatprep.subr.bf16.mxu1 %v1014_v48 }
 0x15f   :  { %1017 = vmatpush3.bf16.msra.mxu1 %v1014_v48 }
 0x215   :  { %v835_v18 = vpop.f32.mrb[0].mxu1 }
 0x216   :  { %v364_v21 = vadd.f32 %v835_v18, %v699_v17  ;;  %v358_v22 = vpop.f32.mrb[1].mxu1 }
 0x217   :  { %v359_v23 = vadd.f32 %v699_v17, %v358_v22 }
 0x218   :  { %v431_v20 = vmul.f32 %v707_v19, %v364_v21 }
 0x219   :  { %868 = vmatprep.mubr.f32.mxu0 %v359_v23  ;;  %v430_v24 = vmul.f32 %v707_v19, %v359_v23  ;;  %v550_v19 = vshrl.u32 %v549_v16, 7 }
 0x21a   :  { %434 = vadd.xlane.f32.xlu1 %v431_v20  ;;  %869 = vmatmul.mubr.f32.vlgmr.msra.gmra.mrb[2].mxu0 %v364_v21  ;;  %v548_v20 = vld [vmem:[#allocation10 + $0x4] sm:$0x7] }
 0x21b   :  { %432 = vadd.xlane.f32.xlu0 %v430_v24  ;;  %v551_v21 = vsub.s32 0, %v550_v19  ;;  %v559_v22 = vsub.s32 1, %v550_v19  ;;  %v567_v25 = vsub.s32 2, %v550_v19 }
 0x21d   :  { %v552_v24 = vrot.slane %v548_v20, %v551_v21  ;;  %v560_v30 = vrot.slane %v548_v20, %v559_v22  ;;  %v568_v35 = vrot.slane %v548_v20, %v567_v25 }
 0x2a7   :  { %v435_v59 = vpop.xlane.xlu1 %434 }
 0x2a8   :  { %v433_v61 = vpop.xlane.xlu0 %432  ;;  %v439_v0 = vadd.f32 %v437_v58, %v435_v59 }
 0x2a9   :  { %v438_v2 = vadd.f32 %v437_v58, %v433_v61 }
 0x2aa   :  { %v710_v4 = vmul.f32 -1.442695, %v439_v0 }
 0x2ab   :  { %v709_v5 = vmul.f32 -1.442695, %v438_v2 }
 0x2ac   :  { %1036 = vpow2.f32 %v710_v4 }
 0x2ad   :  { %1038 = vpow2.f32 %v709_v5 }
 0x2ae   :  { %1040 = vrcp.f32 %v391_v9 }
 0x2af   :  { %1042 = vrcp.f32 %v420_v11 }
 0x2b0   :  { %1044 = vrcp.f32 %v390_v13 }
 0x2b1   :  { %1046 = vrcp.f32 %v419_v15 }
 0x2b6   :  { %v1037_v12 = vpop.eup %1036 }
 0x2b7   :  { %v1039_v14 = vpop.eup %1038  ;;  %v447_v17 = vadd.f32 1.0, %v1037_v12 }
 0x2b8   :  { %v446_v18 = vadd.f32 1.0, %v1039_v14  ;;  %v1041_v23 = vpop.eup %1040 }
 0x2b9   :  { %1048 = vrcp.f32 %v447_v17  ;;  %v1043_v26 = vpop.eup %1042  ;;  %v554_v29 = vmul.f32 %v1041_v23, %v552_v24 }
 0x2ba   :  { %1050 = vrcp.f32 %v446_v18  ;;  %v1045_v28 = vpop.eup %1044  ;;  %v562_v34 = vmul.f32 %v1043_v26, %v560_v30 }
 0x2bb   :  { %v1047_v32 = vpop.eup %1046  ;;  %v553_v39 = vmul.f32 %v1045_v28, %v552_v24 }
 0x2bc   :  { %v561_v43 = vmul.f32 %v1047_v32, %v560_v30 }
 0x2c3   :  { %v1049_v37 = vpop.eup %1048 }
 0x2c4   :  { %v1051_v40 = vpop.eup %1050  ;;  %v570_v45 = vmul.f32 %v1049_v37, %v568_v35 }
 0x2c5   :  { %v569_v47 = vmul.f32 %v1051_v40, %v568_v35 }
 0x2ed   :  { %v870_v31 = vpop.f32.mrb[2].mxu0 }
 0x2ee   :  { %v545_v33 = vadd.f32 %v870_v31, %v711_v27  ;;  %v539_v36 = vpop.f32.mrb[3].mxu0 }
 0x2ef   :  { %v540_v38 = vadd.f32 %v711_v27, %v539_v36 }
 0x2f0   :  { %v556_v41 = vadd.f32 %v554_v29, %v545_v33 }
 0x2f1   :  { %v555_v42 = vadd.f32 %v553_v39, %v540_v38 }
 0x2f2   :  { %v564_v44 = vadd.f32 %v562_v34, %v556_v41 }
 0x2f3   :  { %v563_v46 = vadd.f32 %v561_v43, %v555_v42 }
 0x2f4   :  { %v572_v48 = vadd.f32 %v570_v45, %v564_v44 }
 0x2f5   :  { %v571_v49 = vadd.f32 %v569_v47, %v563_v46 }
 0x2f6   :  { %v574_v51 = vmax.f32 %v572_v48, 0.0 }
 0x2f7   :  { %v573_v50 = vmax.f32 %v571_v49, 0.0 }
 0x2f9   :  { %903 = vmatprep.mubr.f32.mxu1 %v573_v50 }
 0x2fa   :  { %904 = vmatmul.mubr.f32.vlgmr.msra.gmra.mrb[2].mxu1 %v574_v51 }
 0x3cd   :  { %v905_v53 = vpop.f32.mrb[2].mxu1 }
 0x3ce   :  { %v668_v54 = vadd.f32 %v905_v53, %v712_v52  ;;  %v662_v55 = vpop.f32.mrb[3].mxu1 }
 0x3cf   :  { %v663_v56 = vadd.f32 %v712_v52, %v662_v55 }
 0x3d0   :  { %673 = vst.msk [vmem:[#allocation12 + $0x8] sm:$0xff] %vm671_vm1, %v668_v54 }
 0x3d1   :  { %672 = vst.msk [vmem:[#allocation12] sm:$0xff] %vm671_vm1, %v663_v56 }
 0x3d2   :  { %1161 = shalt.err (!%p1158_p11)
}
 0x3d3   :  { %s1162_s9 = scalar_lea.hbm %s1328_s5, 256 }
 0x3d4   :  { %p1163_p12 = scmp.ne.s32.totalorder %s1328_s5, %s1162_s9  ;;  %p1166_p13 = scmp.lt.u32.totalorder %s1162_s9, %s1328_s5 }
 0x3d6   :  { %p1168_p0 = pnand %p1166_p13, %p1163_p12 }
 0x3d8   :  { %1171 = shalt.err (!%p1168_p0)
}
 0x3d9   :  { %685 = dma.vmem_to_hbm [thread:$0]  %s680_s28, 256, %s1328_s5, [#allocation4], %s1184_s30, %s1184_s30, %s1185_s6  }
 0x3da   :  { %1180 = dma.done.wait [#allocation4], 256  }
 0x3db   :  { %1181 = vsyncadd [#allocation4], 4294967040 }
 0x3dc   :  { %689 = vsyncpa [#allocation3], 1 }
 0x3dd   :  { %690 = vsyncpa [#allocation8], 1 }
 0x3de   :  { %691 = vsyncpa [#allocation11], 1 }
 0x3df   :  { %692 = vsyncpa [#allocation4], 1 }
 0x3e0   :  { %693 = vsyncpa [#allocation5], 1 }

</bundles_post_ra>
